<compile_context>
chip_gen: v7x
topology: tpu7x:2x2x1
jax: 0.10.0
libtpu: 0.0.40
codegen_flags: <defaults>
</compile_context>

<pallas_src>
import math

import jax
import jax.numpy as jnp
from jax import lax
from jax.experimental import pallas as pl
from jax.experimental.pallas import tpu as pltpu

NEGATIVE_SLOPE = 0.01
ELU_ALPHA = 1.0
_INV_SQRT2 = 1.0 / math.sqrt(2.0)

_LANE = 128
_TARGET_BLOCK_BYTES = 4 << 20  # ~4 MiB per block (in+out double-buffered: 16 MiB)


def _combined_coeffs(weights):
    """softmax(weights) -> 7 fused scalar coefficients (f32)."""
    w = jax.nn.softmax(weights.astype(jnp.float32), axis=0)
    half_w4 = 0.5 * w[4]
    return jnp.stack(
        [
            0.5 * w[0],                                   # c0: sigmoid
            0.5 * w[6],                                   # c1: silu
            2.0 * w[1],                                   # c2: tanh
            half_w4,                                      # c3: gelu erf term
            w[2] + w[3] + w[5] + half_w4,                 # c4: x>0 linear
            w[3] * NEGATIVE_SLOPE + half_w4,              # c5: x<=0 linear
            w[5] * ELU_ALPHA,                             # c6: x<=0 exp(x)-1
        ]
    ).astype(jnp.float32)


def _ensemble_math(x, c):
    """Shared f32 math. c = (c0..c6) scalars. Two heavy EUP ops: tanh, erf."""
    c0, c1, c2, c3, c4, c5, c6 = c
    t = jnp.tanh(0.5 * x)                                  # heavy EUP #1
    # w0*sigmoid(x) + w6*silu(x)  ==  (t+1) * (c0 + c1*x)
    out = (t + 1.0) * (c0 + c1 * x)
    # w1*tanh(x), using tanh(x) = 2t / (1 + t^2)
    out = out + (c2 * t) / (1.0 + t * t)
    # w4*gelu(x): erf part here; the unconditional 0.5*w4*x is folded into c4/c5.
    out = out + c3 * (x * lax.erf(x * _INV_SQRT2))         # heavy EUP #2
    # w2*relu + w3*leaky_relu + w5*elu + gelu-linear as one masked select.
    # exp(x)-1 = 2t/(1-t); clamp the denominator so the dead (x>0) branch stays
    # finite (the live x<=0 branch always has 1-t >= 1).
    em1 = (2.0 * t) / jnp.maximum(1.0 - t, 1e-20)
    out = out + jnp.where(x > 0.0, c4 * x, c5 * x + c6 * em1)
    return out


def _ensemble_kernel(c_ref, x_ref, o_ref):
    """c_ref: SMEM (7,) fused coefficients; x_ref/o_ref: VMEM (row_tile, lanes)."""
    x = x_ref[...].astype(jnp.float32)
    c = tuple(c_ref[i] for i in range(7))
    o_ref[...] = _ensemble_math(x, c).astype(o_ref.dtype)


def _run_pallas(x2d, coeffs, out_dtype):
    rows, lanes = x2d.shape

    # Row tile sized for ~_TARGET_BLOCK_BYTES per block (multiple of 8).
    itemsize = x2d.dtype.itemsize
    row_tile = max(8, ((_TARGET_BLOCK_BYTES // itemsize) // lanes) // 8 * 8)
    if rows >= 16:
        # Guarantee >= 2 grid blocks so the "parallel" axis can shard across
        # v7x's two TensorCores (cap stays a multiple of 8 and < rows).
        row_tile = min(row_tile, max(8, (pl.cdiv(rows, 2) // 8) * 8))
    else:
        row_tile = rows  # single full-extent block (dims need not be 8-aligned)

    grid = (pl.cdiv(rows, row_tile),)

    return pl.pallas_call(
        _ensemble_kernel,
        out_shape=jax.ShapeDtypeStruct((rows, lanes), out_dtype),
        grid_spec=pltpu.PrefetchScalarGridSpec(
            num_scalar_prefetch=0,
            grid=grid,
            in_specs=[
                pl.BlockSpec(memory_space=pltpu.MemorySpace.SMEM),
                pl.BlockSpec((row_tile, lanes), lambda i: (i, 0)),
            ],
            out_specs=pl.BlockSpec((row_tile, lanes), lambda i: (i, 0)),
        ),
        compiler_params=pltpu.CompilerParams(
            dimension_semantics=("parallel",),
            vmem_limit_bytes=32 * 1024 * 1024,
        ),
    )(coeffs, x2d)


def activation_ensemble(x, weights):
    """x: any-shape float array (e.g. NCHW). weights: (7,) ensemble logits."""
    orig_shape = x.shape
    orig_dtype = x.dtype

    coeffs = _combined_coeffs(weights)

    flat = x.reshape(-1)
    n = flat.shape[0]
    n_main = (n // _LANE) * _LANE
    tail = n - n_main

    main_out = None
    if n_main > 0:
        main = flat if tail == 0 else flat[:n_main]
        # Widest lane-dense last dim dividing the aligned element count.
        lanes = _LANE
        for cand in (1024, 512, 256):
            if n_main % cand == 0:
                lanes = cand
                break
        rows = n_main // lanes
        x2d = main.reshape(rows, lanes)
        main_out = _run_pallas(x2d, coeffs, orig_dtype).reshape(-1)

    if tail:
        # <=127-element remainder: tiny fused XLA epilogue (no full-array pad
        # or slice passes over HBM).
        tail_x = flat[n_main:].astype(jnp.float32)
        c = tuple(coeffs[i] for i in range(7))
        tail_out = _ensemble_math(tail_x, c).astype(orig_dtype)
        out_flat = tail_out if main_out is None else jnp.concatenate([main_out, tail_out])
    else:
        out_flat = main_out

    return out_flat.reshape(orig_shape)


def _reference(x, weights):
    """Pure-JAX reference mirroring the PyTorch forward."""
    xf = x.astype(jnp.float32)
    acts = [
        jax.nn.sigmoid(xf),
        jnp.tanh(xf),
        jnp.maximum(xf, 0.0),
        jnp.where(xf >= 0.0, xf, NEGATIVE_SLOPE * xf),
        0.5 * xf * (1.0 + lax.erf(xf * _INV_SQRT2)),
        jnp.where(xf > 0.0, xf, ELU_ALPHA * (jnp.exp(xf) - 1.0)),
        xf * jax.nn.sigmoid(xf),
    ]
    w = jax.nn.softmax(weights.astype(jnp.float32), axis=0)
    out = sum(w[i] * a for i, a in enumerate(acts))
    return out.astype(x.dtype)


if __name__ == "__main__":
    key = jax.random.PRNGKey(0)
    # Deterministic parameter init: nn.Parameter(torch.ones(7)).
    ensemble_weights = jnp.ones((7,), dtype=jnp.float32)

    # Primary test: NCHW input matching the PyTorch convention (lane-aligned).
    x = jax.random.normal(key, (2, 4, 16, 16), dtype=jnp.float32)
    out = jax.block_until_ready(activation_ensemble(x, ensemble_weights))
    ref = _reference(x, ensemble_weights)
    assert out.shape == x.shape and out.dtype == x.dtype
    assert jnp.allclose(out, ref, atol=1e-5, rtol=1e-5), "mismatch vs reference"

    # Secondary test: non-lane-aligned element count (exercises the prefix+tail path).
    x2 = jax.random.normal(jax.random.PRNGKey(1), (3, 5, 7, 11), dtype=jnp.float32)
    out2 = jax.block_until_ready(activation_ensemble(x2, ensemble_weights))
    ref2 = _reference(x2, ensemble_weights)
    assert jnp.allclose(out2, ref2, atol=1e-5, rtol=1e-5), "mismatch (ragged path)"

    # Tertiary test: large |x| (exercises the saturated-tanh / exp-overflow regime).
    x3 = x * 12.0
    out3 = jax.block_until_ready(activation_ensemble(x3, ensemble_weights))
    ref3 = _reference(x3, ensemble_weights)
    assert jnp.all(jnp.isfinite(out3)), "non-finite output for large |x|"
    assert jnp.allclose(out3, ref3, atol=1e-4, rtol=1e-5), "mismatch (large |x|)"

    print("KERNEL_OK")
</pallas_src>

<mosaic_0001>
module attributes {stable_mosaic.version = 11 : i64} {
  func.func @_ensemble_kernel(%arg0: i32, %arg1: memref<7xf32, #tpu.memory_space<smem>>, %arg2: memref<2x1024xf32, #tpu.memory_space<vmem>>, %arg3: memref<2x1024xf32, #tpu.memory_space<vmem>>) attributes {dimension_semantics = [#tpu.dimension_semantics<parallel>], iteration_bounds = array<i64: 1>, scalar_prefetch = 0 : i64, scratch_operands = 0 : i64, tpu.core_type = #tpu.core_type<tc>, window_params = [{transform_indices = @transform_0, window_bounds = array<i64: 7>}, {transform_indices = @transform_1, window_bounds = array<i64: 2, 1024>}, {transform_indices = @transform_2, window_bounds = array<i64: 2, 1024>}]} {
    %c0 = arith.constant 0 : index
    %c0_0 = arith.constant 0 : index
    %0 = vector.load %arg2[%c0, %c0_0] : memref<2x1024xf32, #tpu.memory_space<vmem>>, vector<2x1024xf32>
    %c0_1 = arith.constant 0 : index
    %1 = memref.load %arg1[%c0_1] : memref<7xf32, #tpu.memory_space<smem>>
    %c1 = arith.constant 1 : index
    %2 = memref.load %arg1[%c1] : memref<7xf32, #tpu.memory_space<smem>>
    %c2 = arith.constant 2 : index
    %3 = memref.load %arg1[%c2] : memref<7xf32, #tpu.memory_space<smem>>
    %c3 = arith.constant 3 : index
    %4 = memref.load %arg1[%c3] : memref<7xf32, #tpu.memory_space<smem>>
    %c4 = arith.constant 4 : index
    %5 = memref.load %arg1[%c4] : memref<7xf32, #tpu.memory_space<smem>>
    %c5 = arith.constant 5 : index
    %6 = memref.load %arg1[%c5] : memref<7xf32, #tpu.memory_space<smem>>
    %c6 = arith.constant 6 : index
    %7 = memref.load %arg1[%c6] : memref<7xf32, #tpu.memory_space<smem>>
    %cst = arith.constant 5.000000e-01 : f32
    %8 = vector.broadcast %cst : f32 to vector<2x1024xf32>
    %9 = arith.mulf %8, %0 : vector<2x1024xf32>
    %10 = math.tanh %9 : vector<2x1024xf32>
    %cst_2 = arith.constant 1.000000e+00 : f32
    %11 = vector.broadcast %cst_2 : f32 to vector<2x1024xf32>
    %12 = arith.addf %10, %11 : vector<2x1024xf32>
    %13 = vector.broadcast %2 : f32 to vector<2x1024xf32>
    %14 = arith.mulf %13, %0 : vector<2x1024xf32>
    %15 = vector.broadcast %1 : f32 to vector<2x1024xf32>
    %16 = arith.addf %15, %14 : vector<2x1024xf32>
    %17 = arith.mulf %12, %16 : vector<2x1024xf32>
    %18 = vector.broadcast %3 : f32 to vector<2x1024xf32>
    %19 = arith.mulf %18, %10 : vector<2x1024xf32>
    %20 = arith.mulf %10, %10 : vector<2x1024xf32>
    %cst_3 = arith.constant 1.000000e+00 : f32
    %21 = vector.broadcast %cst_3 : f32 to vector<2x1024xf32>
    %22 = arith.addf %21, %20 : vector<2x1024xf32>
    %23 = arith.divf %19, %22 : vector<2x1024xf32>
    %24 = arith.addf %17, %23 : vector<2x1024xf32>
    %cst_4 = arith.constant 0.707106769 : f32
    %25 = vector.broadcast %cst_4 : f32 to vector<2x1024xf32>
    %26 = arith.mulf %0, %25 : vector<2x1024xf32>
    %27 = math.erf %26 : vector<2x1024xf32>
    %28 = arith.mulf %0, %27 : vector<2x1024xf32>
    %29 = vector.broadcast %4 : f32 to vector<2x1024xf32>
    %30 = arith.mulf %29, %28 : vector<2x1024xf32>
    %31 = arith.addf %24, %30 : vector<2x1024xf32>
    %cst_5 = arith.constant 2.000000e+00 : f32
    %32 = vector.broadcast %cst_5 : f32 to vector<2x1024xf32>
    %33 = arith.mulf %32, %10 : vector<2x1024xf32>
    %cst_6 = arith.constant 1.000000e+00 : f32
    %34 = vector.broadcast %cst_6 : f32 to vector<2x1024xf32>
    %35 = arith.subf %34, %10 : vector<2x1024xf32>
    %cst_7 = arith.constant 9.99999968E-21 : f32
    %36 = vector.broadcast %cst_7 : f32 to vector<2x1024xf32>
    %37 = arith.maximumf %35, %36 : vector<2x1024xf32>
    %38 = arith.divf %33, %37 : vector<2x1024xf32>
    %cst_8 = arith.constant 0.000000e+00 : f32
    %39 = vector.broadcast %cst_8 : f32 to vector<2x1024xf32>
    %40 = arith.cmpf ogt, %0, %39 : vector<2x1024xf32>
    %41 = vector.broadcast %5 : f32 to vector<2x1024xf32>
    %42 = arith.mulf %41, %0 : vector<2x1024xf32>
    %43 = vector.broadcast %6 : f32 to vector<2x1024xf32>
    %44 = arith.mulf %43, %0 : vector<2x1024xf32>
    %45 = vector.broadcast %7 : f32 to vector<2x1024xf32>
    %46 = arith.mulf %45, %38 : vector<2x1024xf32>
    %47 = arith.addf %44, %46 : vector<2x1024xf32>
    %48 = arith.select %40, %42, %47 : vector<2x1024xi1>, vector<2x1024xf32>
    %49 = arith.addf %31, %48 : vector<2x1024xf32>
    %c0_9 = arith.constant 0 : index
    %c0_10 = arith.constant 0 : index
    %50 = vector.load %arg3[%c0_9, %c0_10] : memref<2x1024xf32, #tpu.memory_space<vmem>>, vector<2x1024xf32>
    tpu.vector_store %arg3[%c0_9, %c0_10], %49 {strides = array<i32>} : memref<2x1024xf32, #tpu.memory_space<vmem>>, vector<2x1024xf32>,
    return
  }
  func.func @transform_0(%arg0: i32) -> i32 {
    %c0_i32 = arith.constant 0 : i32
    %c0_i32_0 = arith.constant 0 : i32
    return %c0_i32 : i32
  }
  func.func @transform_1(%arg0: i32) -> (i32, i32) {
    %c0_i32 = arith.constant 0 : i32
    %c0_i32_0 = arith.constant 0 : i32
    return %arg0, %c0_i32 : i32, i32
  }
  func.func @transform_2(%arg0: i32) -> (i32, i32) {
    %c0_i32 = arith.constant 0 : i32
    %c0_i32_0 = arith.constant 0 : i32
    return %arg0, %c0_i32 : i32, i32
  }
}

</mosaic_0001>

<bundles_post_ra>
// kernel: tpu_custom_call.1
= control target key start
LH: loop header
LB: loop body
LE: loop exit
PB: predicated region body
PF: predicated region fallthrough
CT: control target
= control target key end

     0   :  { %7 = vsyncpa [#allocation5], 0  ;;  %s302_s0 = inlined_call_operand.hbm [shape: f32[7], index: 0, kind: input, shape index: {}]   ;;  %s303_s1 = inlined_call_operand.hbm [shape: f32[2,1024], index: 1, kind: input, shape index: {}]   ;;  %s304_s2 = inlined_call_operand.hbm [shape: f32[2,1024], index: 2, kind: output, shape index: {}]  }
   0x1   :  { %8 = vsyncpa [#allocation3], 0 }
   0x2   :  { %9 = vsyncpa [#allocation4], 0  ;;  %s152_s11 = scalar_lea.hbm %s302_s0, 16 }
   0x3   :  { %p153_p0 = scmp.ne.s32.totalorder %s302_s0, %s152_s11  ;;  %p156_p1 = scmp.lt.u32.totalorder %s152_s11, %s302_s0 }
   0x5   :  { %p158_p2 = pnand %p156_p1, %p153_p0 }
   0x7   :  { %161 = shalt.err (!%p158_p2)
}
   0x8   :  { %s212_s16 = smov [#allocation2]   ;;  %s213_s19 = smov [#allocation6]  }
   0x9   :  { %17 = dma.hbm_to_smem %s302_s0, 16, %s212_s16, [#allocation5]  }
   0xa   :  { %s24_s20 = sshll.u32 %s213_s19, 4  ;;  %s162_s23 = scalar_lea.hbm %s303_s1, 256  ;;  %s25_s20 = int_to_ptr.vmem [resolvable:$true] %s24_s20 }
   0xb   :  { %p163_p3 = scmp.ne.s32.totalorder %s303_s1, %s162_s23  ;;  %p166_p4 = scmp.lt.u32.totalorder %s162_s23, %s303_s1 }
   0xd   :  { %p168_p5 = pnand %p166_p4, %p163_p3 }
   0xf   :  { %171 = shalt.err (!%p168_p5)
}
  0x10   :  { %s172_s28 = scalar_lea.vmem %s25_s20, 256  ;;  %p177_p7 = scmp.lt.s32.totalorder %s25_s20, %s25_s20 }
  0x11   :  { %p173_p6 = scmp.ne.s32.totalorder %s25_s20, %s172_s28  ;;  %p178_p8 = scmp.lt.s32.totalorder %s172_s28, %s172_s28 }
  0x13   :  { %p179_p9 = por %p178_p8, %p177_p7 }
  0x15   :  { %p180_p10 = pnand %p179_p9, %p173_p6 }
  0x17   :  { %183 = shalt.err (!%p180_p10)
}
  0x18   :  { %27 = dma.hbm_to_vmem [thread:$0]  %s303_s1, 256, %s25_s20, [#allocation3]  }
  0x19   :  { %206 = dma.done.wait [#allocation5], 16  }
  0x1a   :  { %207 = vsyncadd [#allocation5], 4294967280 }
  0x1b   :  { %208 = dma.done.wait [#allocation3], 256  }
  0x1c   :  { %209 = vsyncadd [#allocation3], 4294967040 }
  0x1d   :  { %34 = sfence }
  0x1e   :  { %v254_v0 = vld [vmem:[#allocation6] sm:$0xff]  ;;  %v256_v1 = vld [vmem:[#allocation6 + $0x8] sm:$0xff]  ;;  %s127_s30 = sld [smem:[#allocation2 + $0x1]]  ;;  %s262_s1 = sld [smem:[#allocation2]] }
  0x1f   :  { %v44_v2 = vmul.f32 0.5, %v254_v0  ;;  %v45_v3 = vmul.f32 0.5, %v256_v1  ;;  %v71_v4 = vmul.f32 0.70710677, %v254_v0  ;;  %v72_v5 = vmul.f32 0.70710677, %v256_v1 }
  0x20   :  { %s264_s3 = sld [smem:[#allocation2 + $0x2]]  ;;  %s266_s4 = sld [smem:[#allocation2 + $0x3]]  ;;  %vm92_vm0 = vcmp.gt.f32.partialorder %v254_v0, 0.0  ;;  %vm93_vm1 = vcmp.gt.f32.partialorder %v256_v1, 0.0 }
  0x21   :  { %136 = vtanh.f32 %v44_v2  ;;  %s268_s5 = sld [smem:[#allocation2 + $0x5]]  ;;  %s271_s6 = sld [smem:[#allocation2 + $0x4]] }
  0x22   :  { %138 = vtanh.f32 %v45_v3  ;;  %s274_s7 = sld [smem:[#allocation2 + $0x6]]  ;;  %s214_s8 = smov [#allocation7]  }
  0x23   :  { %140 = verf.f32 %v71_v4  ;;  %s117_s9 = sshll.u32 %s214_s8, 4  ;;  %s118_s9 = int_to_ptr.vmem [resolvable:$true] %s117_s9 }
  0x24   :  { %142 = verf.f32 %v72_v5  ;;  %v50_v10 = vstv %s127_s30  ;;  %v53_v17 = vstv %s262_s1  ;;  %s184_s10 = scalar_lea.vmem %s118_s9, 256  ;;  %p189_p12 = scmp.lt.s32.totalorder %s118_s9, %s118_s9 }
  0x25   :  { %v51_v15 = vmul.f32 %v50_v10, %v254_v0  ;;  %v52_v21 = vmul.f32 %v50_v10, %v256_v1  ;;  %p185_p11 = scmp.ne.s32.totalorder %s118_s9, %s184_s10  ;;  %p190_p13 = scmp.lt.s32.totalorder %s184_s10, %s184_s10 }
  0x26   :  { %v58_v20 = vstv %s264_s3  ;;  %v77_v27 = vstv %s266_s4 }
  0x27   :  { %v54_v23 = vadd.f32 %v53_v17, %v51_v15  ;;  %v55_v30 = vadd.f32 %v53_v17, %v52_v21  ;;  %v97_v32 = vstv %s268_s5  ;;  %v94_v34 = vstv %s271_s6  ;;  %p191_p0 = por %p190_p13, %p189_p12 }
  0x28   :  { %v100_v40 = vstv %s274_s7  ;;  %v98_v43 = vmul.f32 %v97_v32, %v254_v0  ;;  %v95_v48 = vmul.f32 %v94_v34, %v254_v0  ;;  %v99_v54 = vmul.f32 %v97_v32, %v256_v1 }
  0x29   :  { %v96_v57 = vmul.f32 %v94_v34, %v256_v1  ;;  %p192_p1 = pnand %p191_p0, %p185_p11 }
  0x2b   :  { %v137_v6 = vpop.eup %136 }
  0x2c   :  { %v61_v7 = vmul.f32 %v137_v6, %v137_v6  ;;  %v139_v8 = vpop.eup %138  ;;  %v84_v9 = vsub.f32 1.0, %v137_v6  ;;  %v48_v22 = vadd.f32 1.0, %v137_v6  ;;  %v59_v25 = vmul.f32 %v137_v6, %v58_v20 }
  0x2d   :  { %v62_v13 = vmul.f32 %v139_v8, %v139_v8  ;;  %v85_v14 = vsub.f32 1.0, %v139_v8  ;;  %v141_v19 = vpop.eup %140  ;;  %v82_v28 = vmul.f32 2.0, %v137_v6  ;;  %v49_v29 = vadd.f32 1.0, %v139_v8 }
  0x2e   :  { %v63_v11 = vadd.f32 1.0, %v61_v7  ;;  %v86_v12 = vmax.f32 %v84_v9, 1e-20  ;;  %v143_v24 = vpop.eup %142  ;;  %v75_v26 = vmul.f32 %v141_v19, %v254_v0  ;;  %v56_v31 = vmul.f32 %v54_v23, %v48_v22 }
  0x2f   :  { %v64_v16 = vadd.f32 1.0, %v62_v13  ;;  %v87_v18 = vmax.f32 %v85_v14, 1e-20  ;;  %v60_v35 = vmul.f32 %v139_v8, %v58_v20  ;;  %v76_v36 = vmul.f32 %v143_v24, %v256_v1 }
  0x30   :  { %144 = vrcp.f32 %v63_v11  ;;  %v78_v39 = vmul.f32 %v77_v27, %v75_v26  ;;  %v83_v41 = vmul.f32 2.0, %v139_v8  ;;  %v57_v44 = vmul.f32 %v55_v30, %v49_v29 }
  0x31   :  { %146 = vrcp.f32 %v86_v12  ;;  %v79_v51 = vmul.f32 %v77_v27, %v76_v36 }
  0x32   :  { %148 = vrcp.f32 %v64_v16 }
  0x33   :  { %150 = vrcp.f32 %v87_v18 }
  0x3a   :  { %v145_v33 = vpop.eup %144 }
  0x3b   :  { %v147_v37 = vpop.eup %146  ;;  %v66_v38 = vmul.f32 %v145_v33, %v59_v25 }
  0x3c   :  { %v89_v42 = vmul.f32 %v147_v37, %v82_v28  ;;  %v149_v45 = vpop.eup %148 }
  0x3d   :  { %v69_v46 = vadd.f32 %v66_v38, %v56_v31  ;;  %v151_v47 = vpop.eup %150  ;;  %v68_v50 = vmul.f32 %v149_v45, %v60_v35 }
  0x3e   :  { %v101_v49 = vmul.f32 %v100_v40, %v89_v42  ;;  %v91_v53 = vmul.f32 %v151_v47, %v83_v41 }
  0x3f   :  { %v80_v52 = vadd.f32 %v78_v39, %v69_v46  ;;  %v70_v56 = vadd.f32 %v68_v50, %v57_v44 }
  0x40   :  { %v103_v55 = vadd.f32 %v101_v49, %v98_v43  ;;  %v102_v58 = vmul.f32 %v100_v40, %v91_v53 }
  0x41   :  { %v81_v60 = vadd.f32 %v79_v51, %v70_v56 }
  0x42   :  { %v105_v59 = vsel %vm92_vm0, %v95_v48, %v103_v55  ;;  %v104_v62 = vadd.f32 %v102_v58, %v99_v54 }
  0x43   :  { %v107_v61 = vadd.f32 %v105_v59, %v80_v52 }
  0x44   :  { %v106_v63 = vsel %vm93_vm1, %v96_v57, %v104_v62 }
  0x45   :  { %109 = vst [vmem:[#allocation7] sm:$0xff] %v107_v61  ;;  %v108_v2 = vadd.f32 %v106_v63, %v81_v60 }
  0x47   :  { %110 = vst [vmem:[#allocation7 + $0x8] sm:$0xff] %v108_v2 }
  0x48   :  { %195 = shalt.err (!%p192_p1)
}
  0x49   :  { %s196_s13 = scalar_lea.hbm %s304_s2, 256 }
  0x4a   :  { %p197_p2 = scmp.ne.s32.totalorder %s304_s2, %s196_s13  ;;  %p200_p3 = scmp.lt.u32.totalorder %s196_s13, %s304_s2 }
  0x4c   :  { %p202_p4 = pnand %p200_p3, %p197_p2 }
  0x4e   :  { %205 = shalt.err (!%p202_p4)
}
  0x4f   :  { %120 = dma.vmem_to_hbm [thread:$0]  %s118_s9, 256, %s304_s2, [#allocation4]  }
  0x50   :  { %210 = dma.done.wait [#allocation4], 256  }
  0x51   :  { %211 = vsyncadd [#allocation4], 4294967040 }
  0x52   :  { %124 = vsyncpa [#allocation3], 1 }
  0x53   :  { %125 = vsyncpa [#allocation4], 1 }
  0x54   :  { %126 = vsyncpa [#allocation5], 1 }

</bundles_post_ra>
